<compile_context>
chip_gen: v6e
topology: v6e:2x2x1
jax: 0.10.0
libtpu: 0.0.40
codegen_flags: <defaults>
</compile_context>

<pallas_src>
import functools
import math

import jax
import jax.numpy as jnp
from jax.experimental import pallas as pl
from jax.experimental.pallas import tpu as pltpu

LANE = 128
TR_MAX = 2048      # rows per grid block: 1 MiB f32 input block, 0.5 MiB bf16
ROW_ALIGN = 16     # sublane alignment valid for both f32 (8) and bf16 (16)


def _round_up(v, m):
    return -(-v // m) * m


def _int_pow(p, e):
    """Static integer power by repeated squaring (e >= 0, traced base p)."""
    if e == 0:
        return jnp.ones_like(p)
    result = None
    base = p
    while e:
        if e & 1:
            result = base if result is None else result * base
        e >>= 1
        if e:
            base = base * base
    return result


def _mixed_loss_kernel(x_ref, t_ref, f_ref, i_ref, st_ref, *,
                       gamma, tr, binary_target):
    """Accumulate focal / dice partial sums into (8,128) resident out blocks."""
    step = pl.program_id(1)

    @pl.when(step == 0)
    def _():
        f_ref[...] = jnp.zeros_like(f_ref)
        i_ref[...] = jnp.zeros_like(i_ref)
        st_ref[...] = jnp.zeros_like(st_ref)

    x = x_ref[...].astype(jnp.float32)
    t = t_ref[...].astype(jnp.float32)

    # --- shared transcendentals (1 exp + 1 log1p + 1 exact recip per elem) ---
    e = jnp.exp(-jnp.abs(x))                  # exp(-|x|) in (0, 1]
    r = 1.0 / (1.0 + e)                       # exact reciprocal = sigmoid(|x|)
    p = jnp.where(x >= 0.0, r, e * r)         # = sigmoid(x)
    bce = jnp.maximum(x, 0.0) - x * t + jnp.log1p(e)   # stable BCE-with-logits

    gi = int(round(gamma))
    is_int_gamma = abs(gamma - gi) < 1e-12 and 0 <= gi <= 8
    if binary_target:
        # sigmoid(-x*(2t-1)) == p + t - 2*p*t exactly for t in {0,1}.
        base = p + t - 2.0 * p * t
        if is_int_gamma:
            mod = _int_pow(base, gi)          # pure VPU (gamma=2 -> 1 mul)
        else:
            mod = jnp.exp(gamma * jnp.log(base))
    else:
        # General (soft-target) fallback: exp(gamma * logsigmoid(-x*(2t-1))).
        z = -x * (t * 2.0 - 1.0)
        logsig = jnp.minimum(z, 0.0) - jnp.log1p(jnp.exp(-jnp.abs(z)))
        mod = jnp.exp(gamma * logsig)
    focal = mod * bce

    def fold(v):
        # (tr, 128) -> (8, 128): tile-aligned reshape + leading-axis VPU adds.
        return jnp.sum(v.reshape(tr // 8, 8, LANE), axis=0)

    f_ref[...] += fold(focal)
    i_ref[...] += fold(p * t)
    st_ref[...] += fold(p + t)


def mixed_loss(x, target, alpha, gamma, *, binary_target=True):
    """alpha * FocalLoss(gamma)(x, target) - log(dice_loss(x, target))."""
    if x.shape != target.shape:
        raise ValueError("Target size must be the same as input size")
    n = x.size
    assert n < 2**31, "element count must fit in int32"
    alpha = float(alpha)
    gamma = float(gamma)

    rows_raw = -(-n // LANE)
    tr = min(_round_up(rows_raw, ROW_ALIGN), TR_MAX)
    blocks_needed = -(-rows_raw // tr)
    nc = 2 if blocks_needed >= 2 else 1       # 2-TC split on v7x when tiled
    steps = -(-blocks_needed // nc)
    rows = nc * steps * tr
    pad = rows * LANE - n                     # zero-pad to whole blocks

    t_dtype = jnp.bfloat16 if binary_target else jnp.float32
    xf = jnp.ravel(x).astype(jnp.float32)
    tf = jnp.ravel(target).astype(t_dtype)
    if pad:
        xf = jnp.pad(xf, (0, pad))
        tf = jnp.pad(tf, (0, pad))
    x2 = xf.reshape(rows, LANE)
    t2 = tf.reshape(rows, LANE)

    kernel = functools.partial(_mixed_loss_kernel, gamma=gamma, tr=tr,
                               binary_target=binary_target)

    part = jax.ShapeDtypeStruct((nc, 8, LANE), jnp.float32)
    in_map = lambda c, i: (c * steps + i, 0)
    out_map = lambda c, i: (c, 0, 0)

    f_out, i_out, st_out = pl.pallas_call(
        kernel,
        out_shape=(part, part, part),
        grid_spec=pltpu.PrefetchScalarGridSpec(
            num_scalar_prefetch=0,
            grid=(nc, steps),
            in_specs=[
                pl.BlockSpec((tr, LANE), in_map),
                pl.BlockSpec((tr, LANE), in_map),
            ],
            out_specs=[
                pl.BlockSpec((None, 8, LANE), out_map),
                pl.BlockSpec((None, 8, LANE), out_map),
                pl.BlockSpec((None, 8, LANE), out_map),
            ],
        ),
        compiler_params=pltpu.CompilerParams(
            dimension_semantics=("parallel", "arbitrary"),
            vmem_limit_bytes=32 * 1024 * 1024),
    )(x2, t2)

    # ---- finalize in XLA (tiny): pad correction, mean, dice, log ----
    # Pad elements have x=0, t=0:  focal = (0.5**gamma)*ln2,  s*t = 0,  s+t = 0.5
    focal_sum = jnp.sum(f_out)
    inter = jnp.sum(i_out)
    st_sum = jnp.sum(st_out)
    if pad:
        focal_sum = focal_sum - pad * ((0.5 ** gamma) * math.log(2.0))
        st_sum = st_sum - pad * 0.5

    focal_mean = focal_sum / jnp.float32(n)
    smooth = jnp.float32(1.0)
    dice = (2.0 * inter + smooth) / (st_sum + smooth)
    return alpha * focal_mean - jnp.log(dice)


def _mixed_loss_ref(x, t, alpha, gamma):
    """Pure-JAX reference matching the PyTorch module semantics."""
    x = x.astype(jnp.float32)
    t = t.astype(jnp.float32)
    max_val = jnp.maximum(-x, 0.0)
    bce = x - x * t + max_val + jnp.log(jnp.exp(-max_val) + jnp.exp(-x - max_val))
    z = -x * (t * 2.0 - 1.0)
    invprobs = jnp.minimum(z, 0.0) - jnp.log1p(jnp.exp(-jnp.abs(z)))
    focal = jnp.mean(jnp.exp(invprobs * gamma) * bce)
    s = jax.nn.sigmoid(x)
    dice = (2.0 * jnp.sum(s * t) + 1.0) / (jnp.sum(s) + jnp.sum(t) + 1.0)
    return alpha * focal - jnp.log(dice)


if __name__ == "__main__":
    # MixedLoss(alpha, gamma) "parameters" — deterministic scalars.
    alpha = 10.0
    gamma = 2.0

    key = jax.random.PRNGKey(0)
    k1, k2 = jax.random.split(key)
    # Segmentation-style logits / binary targets, NCHW small shapes.
    x = jax.random.normal(k1, (2, 4, 16, 16), dtype=jnp.float32)
    target = (jax.random.uniform(k2, (2, 4, 16, 16)) > 0.5).astype(jnp.float32)

    out = mixed_loss(x, target, alpha, gamma)
    out = jax.block_until_ready(out)

    ref = _mixed_loss_ref(x, target, alpha, gamma)
    assert jnp.allclose(out, ref, rtol=1e-5, atol=1e-5), (out, ref)

    print("KERNEL_OK")
</pallas_src>

<mosaic_0001>
module attributes {stable_mosaic.version = 11 : i64} {
  func.func @_mixed_loss_kernel(%arg0: i32, %arg1: i32, %arg2: memref<16x128xf32, #tpu.memory_space<vmem>>, %arg3: memref<16x128xbf16, #tpu.memory_space<vmem>>, %arg4: memref<1x8x128xf32, #tpu.memory_space<vmem>>, %arg5: memref<1x8x128xf32, #tpu.memory_space<vmem>>, %arg6: memref<1x8x128xf32, #tpu.memory_space<vmem>>) attributes {dimension_semantics = [#tpu.dimension_semantics<parallel>, #tpu.dimension_semantics<arbitrary>], iteration_bounds = array<i64: 1, 1>, scalar_prefetch = 0 : i64, scratch_operands = 0 : i64, tpu.core_type = #tpu.core_type<tc>, window_params = [{transform_indices = @transform_0, window_bounds = array<i64: 16, 128>}, {transform_indices = @transform_1, window_bounds = array<i64: 16, 128>}, {transform_indices = @transform_2, window_bounds = array<i64: 1, 8, 128>}, {transform_indices = @transform_3, window_bounds = array<i64: 1, 8, 128>}, {transform_indices = @transform_4, window_bounds = array<i64: 1, 8, 128>}]} {
    %c0_i32 = arith.constant 0 : i32
    %0 = arith.cmpi eq, %arg1, %c0_i32 : i32
    %1 = arith.extui %0 : i1 to i32
    %c0_i32_0 = arith.constant 0 : i32
    %2 = arith.cmpi ne, %1, %c0_i32_0 : i32
    scf.if %2 {
      %cst_30 = arith.constant 0.000000e+00 : f32
      %57 = vector.broadcast %cst_30 : f32 to vector<8x128xf32>
      %c0_31 = arith.constant 0 : index
      %c0_32 = arith.constant 0 : index
      %c0_33 = arith.constant 0 : index
      %58 = vector.load %arg4[%c0_31, %c0_32, %c0_33] : memref<1x8x128xf32, #tpu.memory_space<vmem>>, vector<1x8x128xf32>
      %59 = vector.shape_cast %58 : vector<1x8x128xf32> to vector<8x128xf32>
      %60 = vector.shape_cast %57 : vector<8x128xf32> to vector<1x8x128xf32>
      tpu.vector_store %arg4[%c0_31, %c0_32, %c0_33], %60 {strides = array<i32>} : memref<1x8x128xf32, #tpu.memory_space<vmem>>, vector<1x8x128xf32>,
      %cst_34 = arith.constant 0.000000e+00 : f32
      %61 = vector.broadcast %cst_34 : f32 to vector<8x128xf32>
      %c0_35 = arith.constant 0 : index
      %c0_36 = arith.constant 0 : index
      %c0_37 = arith.constant 0 : index
      %62 = vector.load %arg5[%c0_35, %c0_36, %c0_37] : memref<1x8x128xf32, #tpu.memory_space<vmem>>, vector<1x8x128xf32>
      %63 = vector.shape_cast %62 : vector<1x8x128xf32> to vector<8x128xf32>
      %64 = vector.shape_cast %61 : vector<8x128xf32> to vector<1x8x128xf32>
      tpu.vector_store %arg5[%c0_35, %c0_36, %c0_37], %64 {strides = array<i32>} : memref<1x8x128xf32, #tpu.memory_space<vmem>>, vector<1x8x128xf32>,
      %cst_38 = arith.constant 0.000000e+00 : f32
      %65 = vector.broadcast %cst_38 : f32 to vector<8x128xf32>
      %c0_39 = arith.constant 0 : index
      %c0_40 = arith.constant 0 : index
      %c0_41 = arith.constant 0 : index
      %66 = vector.load %arg6[%c0_39, %c0_40, %c0_41] : memref<1x8x128xf32, #tpu.memory_space<vmem>>, vector<1x8x128xf32>
      %67 = vector.shape_cast %66 : vector<1x8x128xf32> to vector<8x128xf32>
      %68 = vector.shape_cast %65 : vector<8x128xf32> to vector<1x8x128xf32>
      tpu.vector_store %arg6[%c0_39, %c0_40, %c0_41], %68 {strides = array<i32>} : memref<1x8x128xf32, #tpu.memory_space<vmem>>, vector<1x8x128xf32>,
    } else {
    }
    %c0 = arith.constant 0 : index
    %c0_1 = arith.constant 0 : index
    %3 = vector.load %arg2[%c0, %c0_1] : memref<16x128xf32, #tpu.memory_space<vmem>>, vector<16x128xf32>
    %c0_2 = arith.constant 0 : index
    %c0_3 = arith.constant 0 : index
    %4 = vector.load %arg3[%c0_2, %c0_3] : memref<16x128xbf16, #tpu.memory_space<vmem>>, vector<16x128xbf16>
    %5 = arith.extf %4 : vector<16x128xbf16> to vector<16x128xf32>
    %6 = math.absf %3 : vector<16x128xf32>
    %cst = arith.constant 0.000000e+00 : f32
    %7 = vector.broadcast %cst : f32 to vector<16x128xf32>
    %8 = arith.subf %7, %6 : vector<16x128xf32>
    %9 = math.exp %8 : vector<16x128xf32>
    %cst_4 = arith.constant 1.000000e+00 : f32
    %10 = vector.broadcast %cst_4 : f32 to vector<16x128xf32>
    %11 = arith.addf %10, %9 : vector<16x128xf32>
    %cst_5 = arith.constant 1.000000e+00 : f32
    %12 = vector.broadcast %cst_5 : f32 to vector<16x128xf32>
    %13 = arith.divf %12, %11 : vector<16x128xf32>
    %cst_6 = arith.constant 0.000000e+00 : f32
    %14 = vector.broadcast %cst_6 : f32 to vector<16x128xf32>
    %15 = arith.cmpf oge, %3, %14 : vector<16x128xf32>
    %16 = arith.mulf %9, %13 : vector<16x128xf32>
    %17 = arith.select %15, %13, %16 : vector<16x128xi1>, vector<16x128xf32>
    %cst_7 = arith.constant 0.000000e+00 : f32
    %18 = vector.broadcast %cst_7 : f32 to vector<16x128xf32>
    %19 = arith.maximumf %3, %18 : vector<16x128xf32>
    %20 = arith.mulf %3, %5 : vector<16x128xf32>
    %21 = arith.subf %19, %20 : vector<16x128xf32>
    %22 = math.log1p %9 : vector<16x128xf32>
    %23 = arith.addf %21, %22 : vector<16x128xf32>
    %24 = arith.addf %17, %5 : vector<16x128xf32>
    %cst_8 = arith.constant 2.000000e+00 : f32
    %25 = vector.broadcast %cst_8 : f32 to vector<16x128xf32>
    %26 = arith.mulf %25, %17 : vector<16x128xf32>
    %27 = arith.mulf %26, %5 : vector<16x128xf32>
    %28 = arith.subf %24, %27 : vector<16x128xf32>
    %29 = arith.mulf %28, %28 : vector<16x128xf32>
    %30 = arith.mulf %29, %23 : vector<16x128xf32>
    %c0_9 = arith.constant 0 : index
    %c0_10 = arith.constant 0 : index
    %c0_11 = arith.constant 0 : index
    %31 = vector.load %arg4[%c0_9, %c0_10, %c0_11] : memref<1x8x128xf32, #tpu.memory_space<vmem>>, vector<1x8x128xf32>
    %32 = vector.shape_cast %31 : vector<1x8x128xf32> to vector<8x128xf32>
    %33 = vector.shape_cast %30 : vector<16x128xf32> to vector<2x8x128xf32>
    %cst_12 = arith.constant dense<0.000000e+00> : vector<8x128xf32>
    %34 = vector.multi_reduction <add>, %33, %cst_12 [0] : vector<2x8x128xf32> to vector<8x128xf32>
    %35 = arith.addf %32, %34 : vector<8x128xf32>
    %c0_13 = arith.constant 0 : index
    %c0_14 = arith.constant 0 : index
    %c0_15 = arith.constant 0 : index
    %36 = vector.load %arg4[%c0_13, %c0_14, %c0_15] : memref<1x8x128xf32, #tpu.memory_space<vmem>>, vector<1x8x128xf32>
    %37 = vector.shape_cast %36 : vector<1x8x128xf32> to vector<8x128xf32>
    %38 = vector.shape_cast %35 : vector<8x128xf32> to vector<1x8x128xf32>
    tpu.vector_store %arg4[%c0_13, %c0_14, %c0_15], %38 {strides = array<i32>} : memref<1x8x128xf32, #tpu.memory_space<vmem>>, vector<1x8x128xf32>,
    %c0_16 = arith.constant 0 : index
    %c0_17 = arith.constant 0 : index
    %c0_18 = arith.constant 0 : index
    %39 = vector.load %arg5[%c0_16, %c0_17, %c0_18] : memref<1x8x128xf32, #tpu.memory_space<vmem>>, vector<1x8x128xf32>
    %40 = vector.shape_cast %39 : vector<1x8x128xf32> to vector<8x128xf32>
    %41 = arith.mulf %17, %5 : vector<16x128xf32>
    %42 = vector.shape_cast %41 : vector<16x128xf32> to vector<2x8x128xf32>
    %cst_19 = arith.constant dense<0.000000e+00> : vector<8x128xf32>
    %43 = vector.multi_reduction <add>, %42, %cst_19 [0] : vector<2x8x128xf32> to vector<8x128xf32>
    %44 = arith.addf %40, %43 : vector<8x128xf32>
    %c0_20 = arith.constant 0 : index
    %c0_21 = arith.constant 0 : index
    %c0_22 = arith.constant 0 : index
    %45 = vector.load %arg5[%c0_20, %c0_21, %c0_22] : memref<1x8x128xf32, #tpu.memory_space<vmem>>, vector<1x8x128xf32>
    %46 = vector.shape_cast %45 : vector<1x8x128xf32> to vector<8x128xf32>
    %47 = vector.shape_cast %44 : vector<8x128xf32> to vector<1x8x128xf32>
    tpu.vector_store %arg5[%c0_20, %c0_21, %c0_22], %47 {strides = array<i32>} : memref<1x8x128xf32, #tpu.memory_space<vmem>>, vector<1x8x128xf32>,
    %c0_23 = arith.constant 0 : index
    %c0_24 = arith.constant 0 : index
    %c0_25 = arith.constant 0 : index
    %48 = vector.load %arg6[%c0_23, %c0_24, %c0_25] : memref<1x8x128xf32, #tpu.memory_space<vmem>>, vector<1x8x128xf32>
    %49 = vector.shape_cast %48 : vector<1x8x128xf32> to vector<8x128xf32>
    %50 = arith.addf %17, %5 : vector<16x128xf32>
    %51 = vector.shape_cast %50 : vector<16x128xf32> to vector<2x8x128xf32>
    %cst_26 = arith.constant dense<0.000000e+00> : vector<8x128xf32>
    %52 = vector.multi_reduction <add>, %51, %cst_26 [0] : vector<2x8x128xf32> to vector<8x128xf32>
    %53 = arith.addf %49, %52 : vector<8x128xf32>
    %c0_27 = arith.constant 0 : index
    %c0_28 = arith.constant 0 : index
    %c0_29 = arith.constant 0 : index
    %54 = vector.load %arg6[%c0_27, %c0_28, %c0_29] : memref<1x8x128xf32, #tpu.memory_space<vmem>>, vector<1x8x128xf32>
    %55 = vector.shape_cast %54 : vector<1x8x128xf32> to vector<8x128xf32>
    %56 = vector.shape_cast %53 : vector<8x128xf32> to vector<1x8x128xf32>
    tpu.vector_store %arg6[%c0_27, %c0_28, %c0_29], %56 {strides = array<i32>} : memref<1x8x128xf32, #tpu.memory_space<vmem>>, vector<1x8x128xf32>,
    return
  }
  func.func @transform_0(%arg0: i32, %arg1: i32) -> (i32, i32) {
    %c1_i32 = arith.constant 1 : i32
    %0 = arith.muli %arg0, %c1_i32 : i32
    %1 = arith.addi %0, %arg1 : i32
    %c0_i32 = arith.constant 0 : i32
    %c0_i32_0 = arith.constant 0 : i32
    return %1, %c0_i32 : i32, i32
  }
  func.func @transform_1(%arg0: i32, %arg1: i32) -> (i32, i32) {
    %c1_i32 = arith.constant 1 : i32
    %0 = arith.muli %arg0, %c1_i32 : i32
    %1 = arith.addi %0, %arg1 : i32
    %c0_i32 = arith.constant 0 : i32
    %c0_i32_0 = arith.constant 0 : i32
    return %1, %c0_i32 : i32, i32
  }
  func.func @transform_2(%arg0: i32, %arg1: i32) -> (i32, i32, i32) {
    %c0_i32 = arith.constant 0 : i32
    %c0_i32_0 = arith.constant 0 : i32
    %c0_i32_1 = arith.constant 0 : i32
    return %arg0, %c0_i32, %c0_i32_0 : i32, i32, i32
  }
  func.func @transform_3(%arg0: i32, %arg1: i32) -> (i32, i32, i32) {
    %c0_i32 = arith.constant 0 : i32
    %c0_i32_0 = arith.constant 0 : i32
    %c0_i32_1 = arith.constant 0 : i32
    return %arg0, %c0_i32, %c0_i32_0 : i32, i32, i32
  }
  func.func @transform_4(%arg0: i32, %arg1: i32) -> (i32, i32, i32) {
    %c0_i32 = arith.constant 0 : i32
    %c0_i32_0 = arith.constant 0 : i32
    %c0_i32_1 = arith.constant 0 : i32
    return %arg0, %c0_i32, %c0_i32_0 : i32, i32, i32
  }
}

</mosaic_0001>

<bundles_post_ra>
// kernel: tpu_custom_call.1
= control target key start
LH: loop header
LB: loop body
LE: loop exit
PB: predicated region body
PF: predicated region fallthrough
CT: control target
= control target key end

     0   :  { %10 = vsyncpa [#allocation3], 0  ;;  %s379_s0 = inlined_call_operand.hbm [shape: f32[16,128], index: 0, kind: input, shape index: {}]   ;;  %s380_s1 = inlined_call_operand.hbm [shape: bf16[16,128], index: 1, kind: input, shape index: {}]   ;;  %s381_s2 = inlined_call_operand.hbm [shape: f32[1,8,128], index: 2, kind: output, shape index: {0}]   ;;  %s382_s3 = inlined_call_operand.hbm [shape: f32[1,8,128], index: 3, kind: output, shape index: {1}]   ;;  %s383_s4 = inlined_call_operand.hbm [shape: f32[1,8,128], index: 4, kind: output, shape index: {2}]  }
   0x1   :  { %11 = vsyncpa [#allocation6], 0 }
   0x2   :  { %12 = vsyncpa [#allocation4], 0 }
   0x3   :  { %13 = vsyncpa [#allocation9], 0  ;;  %s318_s15 = smov [#allocation2]  }
   0x4   :  { %s23_s16 = sshll.u32 %s318_s15, 4  ;;  %s24_s16 = int_to_ptr.vmem [resolvable:$true] %s23_s16 }
   0x5   :  { %s218_s17 = scalar_lea.vmem %s24_s16, 256  ;;  %p223_p1 = scmp.lt.s32.totalorder %s24_s16, %s24_s16 }
   0x6   :  { %p219_p0 = scmp.ne.s32.totalorder %s24_s16, %s218_s17  ;;  %p224_p2 = scmp.lt.s32.totalorder %s218_s17, %s218_s17 }
   0x8   :  { %p225_p3 = por %p224_p2, %p223_p1 }
   0xa   :  { %p226_p4 = pnand %p225_p3, %p219_p0 }
   0xc   :  { %229 = shalt.err (!%p226_p4)
}
   0xd   :  { %s319_s18 = smov 128   ;;  %s320_s19 = smov 8  }
   0xe   :  { %29 = dma.hbm_to_vmem [thread:$0]  %s379_s0, 256, %s24_s16, [#allocation3], %s319_s18, %s319_s18, %s320_s19  }
   0xf   :  { %s321_s22 = smov [#allocation5]  }
  0x10   :  { %s39_s23 = sshll.u32 %s321_s22, 4  ;;  %s40_s23 = int_to_ptr.vmem [resolvable:$true] %s39_s23 }
  0x11   :  { %s238_s24 = scalar_lea.vmem %s40_s23, 128  ;;  %p243_p6 = scmp.lt.s32.totalorder %s40_s23, %s40_s23 }
  0x12   :  { %p239_p5 = scmp.ne.s32.totalorder %s40_s23, %s238_s24  ;;  %p244_p7 = scmp.lt.s32.totalorder %s238_s24, %s238_s24 }
  0x14   :  { %p245_p8 = por %p244_p7, %p243_p6 }
  0x16   :  { %p246_p9 = pnand %p245_p8, %p239_p5 }
  0x18   :  { %249 = shalt.err (!%p246_p9)
}
  0x19   :  { %s322_s25 = smov 64   ;;  %s323_s26 = smov 4  }
  0x1a   :  { %45 = dma.hbm_to_vmem [thread:$0]  %s380_s1, 128, %s40_s23, [#allocation6], %s322_s25, %s322_s25, %s323_s26  }
  0x1b   :  { %310 = dma.done.wait [#allocation3], 256  }
  0x1c   :  { %311 = vsyncadd [#allocation3], 4294967040 }
  0x1d   :  { %312 = dma.done.wait [#allocation6], 128  }
  0x1e   :  { %313 = vsyncadd [#allocation6], 4294967168  ;;  %v63_v0 = vld [vmem:[#allocation2] sm:$0xff]  ;;  %v64_v1 = vld [vmem:[#allocation2 + $0x8] sm:$0xff]  ;;  %s324_s0 = smov [#allocation8]   ;;  %s325_s29 = smov [#allocation10]  }
  0x1f   :  { %v69_v2 = vand.u32 2147483647, %v63_v0  ;;  %v70_v3 = vand.u32 2147483647, %v64_v1  ;;  %v185_v12 = vld [vmem:[#allocation5] sm:$0xff]   ;;  %v89_v18 = vmax.f32 %v63_v0, 0.0 }
  0x20   :  { %v186_v14 = vunpack.c.l.bf16 %v185_v12  ;;  %v187_v16 = vunpack.c.h.bf16 %v185_v12  ;;  %v90_v22 = vmax.f32 %v64_v1, 0.0  ;;  %vm83_vm0 = vcmp.ge.f32.partialorder %v63_v0, 0.0  ;;  %s157_s1 = sshll.u32 %s324_s0, 4  ;;  %s167_s30 = sshll.u32 %s325_s29, 4  ;;  %s158_s1 = int_to_ptr.vmem [resolvable:$true] %s157_s1  ;;  %s168_s30 = int_to_ptr.vmem [resolvable:$true] %s167_s30 }
  0x21   :  { %v71_v4 = vsub.f32 0.0, %v69_v2  ;;  %v72_v5 = vsub.f32 0.0, %v70_v3  ;;  %vm84_vm1 = vcmp.ge.f32.partialorder %v64_v1, 0.0  ;;  %s250_s5 = scalar_lea.vmem %s158_s1, 128  ;;  %p255_p11 = scmp.lt.s32.totalorder %s158_s1, %s158_s1 }
  0x22   :  { %v91_v19 = vmul.f32 %v186_v14, %v63_v0  ;;  %v92_v23 = vmul.f32 %v187_v16, %v64_v1  ;;  %p251_p10 = scmp.ne.s32.totalorder %s158_s1, %s250_s5  ;;  %p256_p12 = scmp.lt.s32.totalorder %s250_s5, %s250_s5 }
  0x23   :  { %v73_v6 = vmul.f32 1.442695, %v71_v4  ;;  %v75_v7 = vmul.f32 1.442695, %v72_v5 }
  0x24   :  { %v93_v31 = vsub.f32 %v89_v18, %v91_v19  ;;  %v94_v36 = vsub.f32 %v90_v22, %v92_v23  ;;  %p257_p13 = por %p256_p12, %p255_p11 }
  0x25   :  { %198 = vpow2.f32 %v73_v6 }
  0x26   :  { %200 = vpow2.f32 %v75_v7  ;;  %p258_p0 = pnand %p257_p13, %p251_p10 }
  0x32   :  { %v199_v8 = vpop.eup %198 }
  0x33   :  { %v201_v9 = vpop.eup %200  ;;  %v77_v10 = vadd.f32 1.0, %v199_v8  ;;  %v98_v13 = vmul.f32 -0.5, %v199_v8  ;;  %v101_v20 = vand.u32 2147483647, %v199_v8 }
  0x34   :  { %v78_v11 = vadd.f32 1.0, %v201_v9  ;;  %v107_v15 = vmul.f32 -0.5, %v201_v9  ;;  %v110_v24 = vand.u32 2147483647, %v201_v9 }
  0x35   :  { %202 = vrcp.f32 %v77_v10  ;;  %v99_v17 = vadd.f32 1.0, %v98_v13  ;;  %vm358_vm2 = vcmp.lt.f32.partialorder %v101_v20, 0.0004427343 }
  0x36   :  { %204 = vrcp.f32 %v78_v11  ;;  %v108_v21 = vadd.f32 1.0, %v107_v15  ;;  %vm362_vm3 = vcmp.lt.f32.partialorder %v110_v24, 0.0004427343 }
  0x37   :  { %206 = vlog2.f32 %v77_v10  ;;  %v100_v28 = vmul.f32 %v199_v8, %v99_v17 }
  0x38   :  { %208 = vlog2.f32 %v78_v11  ;;  %v109_v33 = vmul.f32 %v201_v9, %v108_v21 }
  0x42   :  { %v203_v25 = vpop.eup %202 }
  0x43   :  { %v205_v26 = vpop.eup %204  ;;  %v85_v27 = vmul.f32 %v203_v25, %v199_v8 }
  0x44   :  { %v207_v29 = vpop.eup %206  ;;  %v86_v30 = vmul.f32 %v205_v26, %v201_v9 }
  0x45   :  { %v209_v34 = vpop.eup %208  ;;  %v87_v35 = vsel %vm83_vm0, %v203_v25, %v85_v27  ;;  %v97_v37 = vmul.f32 0.6931472, %v207_v29 }
  0x46   :  { %v88_v39 = vsel %vm84_vm1, %v205_v26, %v86_v30  ;;  %v117_v40 = vmul.f32 2.0, %v87_v35  ;;  %v132_v41 = vmul.f32 %v186_v14, %v87_v35  ;;  %v106_v42 = vmul.f32 0.6931472, %v209_v34 }
  0x47   :  { %v118_v43 = vmul.f32 2.0, %v88_v39  ;;  %v133_v44 = vmul.f32 %v187_v16, %v88_v39  ;;  %v103_v45 = vsel %vm358_vm2, %v100_v28, %v97_v37  ;;  %v115_v46 = vadd.f32 %v186_v14, %v87_v35 }
  0x48   :  { %v112_v47 = vsel %vm362_vm3, %v109_v33, %v106_v42  ;;  %v116_v48 = vadd.f32 %v187_v16, %v88_v39  ;;  %v119_v49 = vmul.f32 %v186_v14, %v117_v40  ;;  %v113_v52 = vadd.f32 %v103_v45, %v93_v31 }
  0x49   :  { %v134_v50 = vadd.f32 %v133_v44, %v132_v41  ;;  %v120_v51 = vmul.f32 %v187_v16, %v118_v43  ;;  %v114_v55 = vadd.f32 %v112_v47, %v94_v36 }
  0x4a   :  { %v121_v53 = vsub.f32 %v115_v46, %v119_v49  ;;  %v138_v54 = vadd.f32 %v116_v48, %v115_v46 }
  0x4b   :  { %v122_v56 = vsub.f32 %v116_v48, %v120_v51  ;;  %136 = vst [vmem:[#allocation8] sm:$0xff] %v134_v50 }
  0x4c   :  { %v123_v57 = vmul.f32 %v121_v53, %v121_v53  ;;  %140 = vst [vmem:[#allocation10] sm:$0xff] %v138_v54 }
  0x4d   :  { %v124_v58 = vmul.f32 %v122_v56, %v122_v56 }
  0x4e   :  { %v125_v59 = vmul.f32 %v123_v57, %v113_v52 }
  0x4f   :  { %261 = shalt.err (!%p258_p0)
}
  0x50   :  { %160 = dma.vmem_to_hbm [thread:$0]  %s158_s1, 128, %s382_s3, [#allocation9]   ;;  %v126_v60 = vmul.f32 %v124_v58, %v114_v55 }
  0x51   :  { %s270_s8 = scalar_lea.vmem %s168_s30, 128  ;;  %p275_p2 = scmp.lt.s32.totalorder %s168_s30, %s168_s30 }
  0x52   :  { %p271_p1 = scmp.ne.s32.totalorder %s168_s30, %s270_s8  ;;  %p276_p3 = scmp.lt.s32.totalorder %s270_s8, %s270_s8 }
  0x54   :  { %p277_p4 = por %p276_p3, %p275_p2 }
  0x56   :  { %p278_p5 = pnand %p277_p4, %p271_p1 }
  0x58   :  { %281 = shalt.err (!%p278_p5)
}
  0x59   :  { %170 = dma.vmem_to_hbm [thread:$0]  %s168_s30, 128, %s383_s4, [#allocation9]   ;;  %v128_v61 = vadd.f32 %v126_v60, %v125_v59 }
  0x5a   :  { %s326_s11 = smov [#allocation7]  }
  0x5b   :  { %s147_s12 = sshll.u32 %s326_s11, 4  ;;  %130 = vst [vmem:[#allocation7] sm:$0xff] %v128_v61  ;;  %s148_s12 = int_to_ptr.vmem [resolvable:$true] %s147_s12 }
  0x5c   :  { %s290_s13 = scalar_lea.vmem %s148_s12, 128  ;;  %p295_p7 = scmp.lt.s32.totalorder %s148_s12, %s148_s12 }
  0x5d   :  { %p291_p6 = scmp.ne.s32.totalorder %s148_s12, %s290_s13  ;;  %p296_p8 = scmp.lt.s32.totalorder %s290_s13, %s290_s13 }
  0x5f   :  { %p297_p9 = por %p296_p8, %p295_p7 }
  0x61   :  { %p298_p10 = pnand %p297_p9, %p291_p6 }
  0x63   :  { %301 = shalt.err (!%p298_p10)
}
  0x64   :  { %150 = dma.vmem_to_hbm [thread:$0]  %s148_s12, 128, %s381_s2, [#allocation4]  }
  0x65   :  { %314 = dma.done.wait [#allocation4], 128  }
  0x66   :  { %315 = vsyncadd [#allocation4], 4294967168 }
  0x67   :  { %316 = dma.done.wait [#allocation9], 256  }
  0x68   :  { %317 = vsyncadd [#allocation9], 4294967040 }
  0x69   :  { %180 = vsyncpa [#allocation3], 1 }
  0x6a   :  { %181 = vsyncpa [#allocation6], 1 }
  0x6b   :  { %182 = vsyncpa [#allocation4], 1 }
  0x6c   :  { %183 = vsyncpa [#allocation9], 1 }

</bundles_post_ra>
